<compile_context>
chip_gen: v6e
topology: v6e:2x2x1
jax: 0.10.0
libtpu: 0.0.40
codegen_flags: <defaults>
</compile_context>

<pallas_src>
import jax
import jax.numpy as jnp
from jax.experimental import pallas as pl
from jax.experimental.pallas import tpu as pltpu

INPUT_DIM = 10
OUTPUT_DIM = 3

_LANE = 128     # lane width: contraction (K) dim padded to this
_SUBLANE = 8    # sublane width: batch dim padded to a multiple of this


def _round_up(n: int, m: int) -> int:
    return ((n + m - 1) // m) * m


def linear_module_kernel(x_ref, wt_ref, b_ref, o_ref):
    # x_ref:  (B_pad, K_pad) f32   -- zero-padded input
    # wt_ref: (K_pad, N)     f32   -- pre-transposed, K-zero-padded weight (W.T)
    # b_ref:  (1,     N)     f32   -- bias
    # o_ref:  (B_pad, N)     f32
    x = x_ref[...]

    # normalize_columns: sum of squares over the batch dim, then rsqrt + mul
    # (rsqrt goes to the EUP slot; avoids a full-rate divide on the VALU).
    col_sums = jnp.sum(x * x, axis=0, keepdims=True)          # (1, K_pad)
    x_norm = x * jax.lax.rsqrt(col_sums + 1e-8)                # (B_pad, K_pad)

    # nn.Linear: x_norm @ W.T + b; W.T is already materialized as wt_ref, so
    # the MXU gets a lane-aligned (K_pad, N) RHS with no in-kernel transpose.
    y = jnp.dot(x_norm, wt_ref[...], preferred_element_type=jnp.float32)
    o_ref[...] = (y + b_ref[...]).astype(o_ref.dtype)


def prepare_params(weight, bias):
    """One-time (module-init) layout prep: W.T zero-padded along K, bias as (1, N)."""
    N, K = weight.shape
    K_pad = max(_round_up(K, _LANE), _LANE)
    wt_p = jnp.zeros((K_pad, N), jnp.float32).at[:K, :].set(weight.T)
    b_p = bias.astype(jnp.float32).reshape(1, N)
    return wt_p, b_p


@jax.jit
def linear_module_forward(x, wt_p, b_p):
    """x: (B, K) f32; wt_p: (K_pad, N) f32; b_p: (1, N) f32 -> (B, N) f32."""
    B, K = x.shape
    K_pad, N = wt_p.shape
    B_pad = max(_round_up(B, _SUBLANE), _SUBLANE)

    # Only per-call layout work: zero-pad x (fused into this jitted program).
    x_p = jnp.zeros((B_pad, K_pad), jnp.float32).at[:B, :K].set(x)

    cost = pl.CostEstimate(
        flops=2 * B_pad * K_pad * N + 3 * B_pad * K_pad,
        transcendentals=K_pad,  # rsqrt over one (1, K_pad) row
        bytes_accessed=4 * (B_pad * K_pad + K_pad * N + N + B_pad * N),
    )

    out = pl.pallas_call(
        linear_module_kernel,
        out_shape=jax.ShapeDtypeStruct((B_pad, N), jnp.float32),
        # Single grid point: every block is the full array (legal even when the
        # last dims are not (8,128)-multiples, since block == full array dims).
        in_specs=[
            pl.BlockSpec((B_pad, K_pad), lambda: (0, 0), memory_space=pltpu.VMEM),
            pl.BlockSpec((K_pad, N), lambda: (0, 0), memory_space=pltpu.VMEM),
            pl.BlockSpec((1, N), lambda: (0, 0), memory_space=pltpu.VMEM),
        ],
        out_specs=pl.BlockSpec((B_pad, N), lambda: (0, 0),
                               memory_space=pltpu.VMEM),
        cost_estimate=cost,
    )(x_p, wt_p, b_p)

    if B_pad != B:
        out = out[:B]
    return out


def reference_forward(x, weight, bias):
    col_sums = jnp.sum(x ** 2, axis=0, keepdims=True)
    x_norm = x / jnp.sqrt(col_sums + 1e-8)
    return x_norm @ weight.T + bias


if __name__ == "__main__":
    key = jax.random.PRNGKey(0)
    kx, kw, kb = jax.random.split(key, 3)

    batch = 8
    # Deterministic synthetic parameters mirroring nn.init.uniform_(a=-1, b=1)
    weight = jax.random.uniform(kw, (OUTPUT_DIM, INPUT_DIM), jnp.float32, -1.0, 1.0)
    bias = jax.random.uniform(kb, (OUTPUT_DIM,), jnp.float32, -1.0, 1.0)
    x = jax.random.normal(kx, (batch, INPUT_DIM), jnp.float32)

    # Module-init analogue: parameter layout prep happens exactly once.
    wt_p, b_p = prepare_params(weight, bias)

    out = linear_module_forward(x, wt_p, b_p)
    out = jax.block_until_ready(out)

    ref = reference_forward(x, weight, bias)
    assert out.shape == (batch, OUTPUT_DIM)
    assert jnp.allclose(out, ref, atol=1e-5, rtol=1e-5), "mismatch vs reference"

    print("KERNEL_OK")
</pallas_src>

<mosaic_0001>
module attributes {stable_mosaic.version = 11 : i64} {
  func.func @linear_module_kernel(%arg0: memref<8x128xf32, #tpu.memory_space<vmem>>, %arg1: memref<128x3xf32, #tpu.memory_space<vmem>>, %arg2: memref<1x3xf32, #tpu.memory_space<vmem>>, %arg3: memref<8x3xf32, #tpu.memory_space<vmem>>) attributes {dimension_semantics = [], scalar_prefetch = 0 : i64, scratch_operands = 0 : i64, tpu.core_type = #tpu.core_type<tc>} {
    %c0 = arith.constant 0 : index
    %c0_0 = arith.constant 0 : index
    %0 = vector.load %arg0[%c0, %c0_0] : memref<8x128xf32, #tpu.memory_space<vmem>>, vector<8x128xf32>
    %1 = arith.mulf %0, %0 : vector<8x128xf32>
    %cst = arith.constant dense<0.000000e+00> : vector<128xf32>
    %2 = vector.multi_reduction <add>, %1, %cst [0] : vector<8x128xf32> to vector<128xf32>
    %3 = vector.shape_cast %2 : vector<128xf32> to vector<1x128xf32>
    %cst_1 = arith.constant 9.99999993E-9 : f32
    %4 = vector.broadcast %cst_1 : f32 to vector<1x128xf32>
    %5 = arith.addf %3, %4 : vector<1x128xf32>
    %6 = math.rsqrt %5 : vector<1x128xf32>
    %7 = vector.broadcast %6 : vector<1x128xf32> to vector<8x128xf32>
    %8 = arith.mulf %0, %7 : vector<8x128xf32>
    %c0_2 = arith.constant 0 : index
    %c0_3 = arith.constant 0 : index
    %9 = vector.load %arg1[%c0_2, %c0_3] : memref<128x3xf32, #tpu.memory_space<vmem>>, vector<128x3xf32>
    %cst_4 = arith.constant dense<0.000000e+00> : vector<8x3xf32>
    %10 = tpu.matmul %8, %9, %cst_4 {dimension_numbers = #tpu.dot_dimension_numbers<[1], [0], [0], [1], [0, 0, 1, 1], [], []>} : vector<8x128xf32>, vector<128x3xf32>, vector<8x3xf32> -> vector<8x3xf32>
    %c0_5 = arith.constant 0 : index
    %c0_6 = arith.constant 0 : index
    %11 = vector.load %arg2[%c0_5, %c0_6] : memref<1x3xf32, #tpu.memory_space<vmem>>, vector<1x3xf32>
    %12 = vector.broadcast %11 : vector<1x3xf32> to vector<8x3xf32>
    %13 = arith.addf %10, %12 : vector<8x3xf32>
    %c0_7 = arith.constant 0 : index
    %c0_8 = arith.constant 0 : index
    %14 = vector.load %arg3[%c0_7, %c0_8] : memref<8x3xf32, #tpu.memory_space<vmem>>, vector<8x3xf32>
    tpu.vector_store %arg3[%c0_7, %c0_8], %13 {strides = array<i32>} : memref<8x3xf32, #tpu.memory_space<vmem>>, vector<8x3xf32>,
    return
  }
}

</mosaic_0001>

<bundles_post_ra>
// kernel: linear_module_forward.1
= control target key start
LH: loop header
LB: loop body
LE: loop exit
PB: predicated region body
PF: predicated region fallthrough
CT: control target
= control target key end

     0   :  { %v181_v0 = vmov 0.0   ;;  %vm182_vm0 = vmmov 0   ;;  %vm118_vm1 = vcmask 23552   ;;  %s260_s1 = inlined_call_operand.vmem [shape: f32[128,3], index: 1, kind: input, shape index: {}]   ;;  %s261_s0 = inlined_call_operand.vmem [shape: f32[8,128], index: 0, kind: input, shape index: {}]   ;;  %s262_s2 = inlined_call_operand.vmem [shape: f32[1,3], index: 2, kind: input, shape index: {}]   ;;  %s263_s3 = inlined_call_operand.vmem [shape: f32[8,3], index: 3, kind: output, shape index: {}]  }
   0x1   :  { %142 = vmatprep.subr.mxu0 %v181_v0  ;;  %v40_v1 = vld [vmem:[%s260_s1 + $0x78] sm:$0xff]  ;;  %v39_v2 = vld [vmem:[%s260_s1 + $0x70] sm:$0xff]  ;;  %174 = vmatprep.mubr.msk.f32.mxu0 %vm182_vm0, %v181_v0  ;;  %v38_v3 = vld [vmem:[%s260_s1 + $0x68] sm:$0xff] }
   0x2   :  { %143 = vmatpush3.msra.mxu0 %v40_v1  ;;  %v37_v4 = vld [vmem:[%s260_s1 + $0x60] sm:$0xff]  ;;  %v36_v6 = vld [vmem:[%s260_s1 + $0x58] sm:$0xff]  ;;  %v35_v8 = vld [vmem:[%s260_s1 + $0x50] sm:$0xff] }
   0x3   :  { %144 = vmatprep.subr.mxu0 %v181_v0  ;;  %v14_v5 = vld [vmem:[%s261_s0] sm:$0xff]  ;;  %v34_v10 = vld [vmem:[%s260_s1 + $0x48] sm:$0xff]  ;;  %v32_v14 = vld [vmem:[%s260_s1 + $0x38] sm:$0xff] }
   0x4   :  { %145 = vmatpush3.msra.mxu0 %v39_v2  ;;  %v15_v7 = vmul.f32 %v14_v5, %v14_v5  ;;  %v33_v12 = vld [vmem:[%s260_s1 + $0x40] sm:$0xff]  ;;  %v31_v16 = vld [vmem:[%s260_s1 + $0x30] sm:$0xff]  ;;  %v30_v18 = vld [vmem:[%s260_s1 + $0x28] sm:$0xff] }
   0x5   :  { %146 = vmatprep.subr.mxu0 %v181_v0  ;;  %v29_v20 = vld [vmem:[%s260_s1 + $0x20] sm:$0xff]  ;;  %v28_v22 = vld [vmem:[%s260_s1 + $0x18] sm:$0xff]  ;;  %v27_v23 = vld [vmem:[%s260_s1 + $0x10] sm:$0xff] }
   0x6   :  { %147 = vmatpush3.msra.mxu0 %v38_v3  ;;  %v16_v9 = vrot.slane %v15_v7, 4  ;;  %v26_v24 = vld [vmem:[%s260_s1 + $0x8] sm:$0xff]  ;;  %v25_v25 = vld [vmem:[%s260_s1] sm:$0xff] }
   0x7   :  { %148 = vmatprep.subr.mxu0 %v181_v0  ;;  %v124_v28 = vld [vmem:[%s262_s2] ss:$0 sm:$0xff] }
   0x8   :  { %149 = vmatpush3.msra.mxu0 %v37_v4  ;;  %v17_v11 = vadd.f32 %v16_v9, %v15_v7 }
   0x9   :  { %150 = vmatprep.subr.mxu0 %v181_v0 }
   0xa   :  { %151 = vmatpush3.msra.mxu0 %v36_v6  ;;  %v18_v13 = vrot.slane %v17_v11, 2 }
   0xb   :  { %152 = vmatprep.subr.mxu0 %v181_v0 }
   0xc   :  { %153 = vmatpush3.msra.mxu0 %v35_v8  ;;  %v19_v15 = vadd.f32 %v18_v13, %v17_v11 }
   0xd   :  { %154 = vmatprep.subr.mxu0 %v181_v0 }
   0xe   :  { %155 = vmatpush3.msra.mxu0 %v34_v10  ;;  %v20_v17 = vrot.slane %v19_v15, 1 }
   0xf   :  { %156 = vmatprep.subr.mxu0 %v181_v0 }
  0x10   :  { %157 = vmatpush3.msra.mxu0 %v33_v12  ;;  %v21_v19 = vadd.f32 %v20_v17, %v19_v15 }
  0x11   :  { %158 = vmatprep.subr.mxu0 %v181_v0 }
  0x12   :  { %159 = vmatpush3.msra.mxu0 %v32_v14  ;;  %v22_v21 = vadd.f32 1e-08, %v21_v19 }
  0x13   :  { %160 = vmatprep.subr.mxu0 %v181_v0 }
  0x14   :  { %161 = vmatpush3.msra.mxu0 %v31_v16  ;;  %179 = vrsqrt.f32 %v22_v21 }
  0x15   :  { %162 = vmatprep.subr.mxu0 %v181_v0 }
  0x16   :  { %163 = vmatpush3.msra.mxu0 %v30_v18 }
  0x17   :  { %164 = vmatprep.subr.mxu0 %v181_v0 }
  0x18   :  { %165 = vmatpush3.msra.mxu0 %v29_v20 }
  0x19   :  { %166 = vmatprep.subr.mxu0 %v181_v0 }
  0x1a   :  { %167 = vmatpush3.msra.mxu0 %v28_v22 }
  0x1b   :  { %168 = vmatprep.subr.mxu0 %v181_v0 }
  0x1c   :  { %169 = vmatpush3.msra.mxu0 %v27_v23 }
  0x1d   :  { %170 = vmatprep.subr.mxu0 %v181_v0 }
  0x1e   :  { %171 = vmatpush3.msra.mxu0 %v26_v24 }
  0x1f   :  { %172 = vmatprep.subr.mxu0 %v181_v0 }
  0x20   :  { %173 = vmatpush3.msra.mxu0 %v25_v25 }
  0x21   :  { %v180_v26 = vpop.eup %179 }
  0x22   :  { %v24_v27 = vmul.f32 %v180_v26, %v14_v5 }
  0x24   :  { %175 = vmatmul.mubr.f32.vlgmr.msra.gmra.mxu0 %v24_v27 }
  0xe4   :  { %v114_v29 = vpop.f32.mrf.mxu0 }
  0xe5   :  { %v115_v30 = vadd.f32 %v124_v28, %v114_v29 }
  0xe6   :  { %v176_v31 = vpop.f32.mrf.mxu0 }
  0xe7   :  { %119 = vst.msk [vmem:[%s263_s3] sm:$0xff] %vm118_vm1, %v115_v30 }

</bundles_post_ra>
